<compile_context>
chip_gen: v6e
topology: v6e:2x2x1
jax: 0.10.0
libtpu: 0.0.40
codegen_flags: <defaults>
</compile_context>

<pallas_src>
import functools

import numpy as np
import jax
import jax.numpy as jnp
from jax import lax
from jax.experimental import pallas as pl
from jax.experimental.pallas import tpu as pltpu


def _tpu_hw_info():
    """Best-effort (num_tensorcores_per_device, physical VMEM bytes)."""
    num_tc, vmem_phys = 1, 128 * 1024 * 1024
    try:
        kind = jax.devices()[0].device_kind.lower()
    except Exception:
        kind = ""
    if "v7" in kind or "tpu7" in kind:
        num_tc, vmem_phys = 2, 64 * 1024 * 1024
    try:
        info = pltpu.get_tpu_info()
        vmem_phys = int(getattr(info, "vmem_capacity_bytes", vmem_phys))
    except Exception:
        pass
    return num_tc, vmem_phys


def _gram_kernel(w_ref, g_ref, *, nk, nk_total, tile_d, tail, mask_needed):
    # grid = (num_splits, nk): axis 0 is a parallel split over D ranges (megacore),
    # axis 1 is the sequential reduction over D tiles within a split.
    k = pl.program_id(1)

    @pl.when(k == 0)
    def _():
        g_ref[...] = jnp.zeros_like(g_ref)

    w = w_ref[...]                                   # (C, tile_d), native dtype

    if mask_needed:
        # Zero out (a) the out-of-bounds columns of the ragged last tile and
        # (b) entire duplicate tiles produced by the core split (index clamped).
        t = pl.program_id(0) * nk + k                # global tile index
        n_valid = jnp.where(t < nk_total - 1, tile_d,
                            jnp.where(t > nk_total - 1, 0, tail))
        col = lax.broadcasted_iota(jnp.int32, w.shape, 1)
        w = jnp.where(col < n_valid, w, jnp.zeros_like(w))

    # W_tile @ W_tile.T on the MXU, f32 accumulation; contraction depth = tile_d.
    g = lax.dot_general(
        w, w,
        dimension_numbers=(((1,), (1,)), ((), ())),
        preferred_element_type=jnp.float32,
    )
    g_ref[...] += g                                  # resident f32 (C, C) block


def gram_ww_t(w, max_slab_bytes=None):
    """Returns G = W @ W.T in f32, streaming W (any float dtype) once from HBM."""
    C, D = w.shape
    dtype_bytes = jnp.dtype(w.dtype).itemsize
    num_tc, vmem_phys = _tpu_hw_info()

    out_bytes = C * C * 4
    # ~8 MiB slabs (amortizes the ~0.35 us/step overhead), shrunk if the resident
    # Gram block is large relative to this chip's VMEM.
    slab_budget = min(8 << 20, max(1 << 20, (vmem_phys // 2 - 2 * out_bytes) // 2))
    if max_slab_bytes is not None:
        slab_budget = int(max_slab_bytes)            # test/override hook
    max_cols = max(128, (slab_budget // max(1, C * dtype_bytes)) // 128 * 128)

    if D <= max_cols:
        tile_d, nk_total = D, 1                      # single slab, no masking
    else:
        tile_d = max_cols                            # multiple of 128 lanes
        nk_total = pl.cdiv(D, tile_d)

    num_splits = num_tc if nk_total >= num_tc else 1   # 2 only on 2-TC chips
    nk = pl.cdiv(nk_total, num_splits)
    has_dup = num_splits * nk != nk_total            # clamped+masked duplicate tiles
    tail = D - (nk_total - 1) * tile_d               # valid cols in the last tile
    mask_needed = has_dup or (tail != tile_d)

    slab_bytes = C * tile_d * dtype_bytes
    vmem_need = 2 * slab_bytes + 2 * out_bytes + (4 << 20)
    vmem_limit = int(min(max(vmem_need, 32 << 20),
                         max(vmem_phys - (12 << 20), 32 << 20)))

    if has_dup:
        w_index_map = lambda s, k: (0, jnp.minimum(s * nk + k, nk_total - 1))
    else:
        w_index_map = lambda s, k: (0, s * nk + k)

    kernel = functools.partial(
        _gram_kernel, nk=nk, nk_total=nk_total, tile_d=tile_d, tail=tail,
        mask_needed=mask_needed)

    g_parts = pl.pallas_call(
        kernel,
        out_shape=jax.ShapeDtypeStruct((num_splits, C, C), jnp.float32),
        grid_spec=pltpu.PrefetchScalarGridSpec(
            num_scalar_prefetch=0,
            grid=(num_splits, nk),
            in_specs=[
                # slab of W along D, native dtype (bf16 halves HBM traffic)
                pl.BlockSpec((C, tile_d), w_index_map),
            ],
            # per-split partial Gram; leading dim squeezed -> kernel sees (C, C)
            out_specs=pl.BlockSpec((None, C, C), lambda s, k: (s, 0, 0)),
        ),
        compiler_params=pltpu.CompilerParams(
            dimension_semantics=("parallel", "arbitrary"),
            vmem_limit_bytes=vmem_limit,
        ),
    )(w)
    return g_parts[0] if num_splits == 1 else jnp.sum(g_parts, axis=0)


def make_projection_vectors(key, n, B, C):
    """Stacked random projection vectors V of shape (n, B, C), each row unit-norm
    (mirrors JacobianReg._random_vector; the C scaling is applied in the loss)."""
    num_proj = n
    if C == 1:
        return jnp.ones((num_proj, B, 1), dtype=jnp.float32), num_proj
    v = jax.random.normal(key, (num_proj, B, C), dtype=jnp.float32)
    vnorm = jnp.linalg.norm(v, axis=-1, keepdims=True)
    return v / vnorm, num_proj


class JacobianRegPallas:
    """Pallas port of JacobianReg: computes (1/2) tr |dy/dx|^2 (estimated)."""

    def __init__(self, n=1):
        assert n == -1 or n > 0
        self.n = n

    def __call__(self, x, y, w, key):
        B, C = y.shape
        G = gram_ww_t(w)                             # (C, C) f32, single pass over W
        if self.n == -1:
            # Exact mode: V stacks B copies of I_C  ->  J2 == tr(G) algebraically.
            J2 = jnp.trace(G)
        else:
            V, num_proj = make_projection_vectors(key, self.n, B, C)
            V2 = V.reshape(num_proj * B, C).astype(jnp.float32)
            sumsq = jnp.sum(V2 * (V2 @ G))           # == ||V W||_F^2
            J2 = C * sumsq / (num_proj * B)
        return 0.5 * J2


if __name__ == "__main__":
    key = jax.random.PRNGKey(0)
    k_x, k_w, k_v, k_big, k_odd = jax.random.split(key, 5)

    # Small shapes consistent with the module's forward (y must be 2D (B, C)).
    B, Cin, H, W_sp = 2, 4, 16, 16
    C_out = 8
    D = Cin * H * W_sp  # 1024

    x = jax.random.normal(k_x, (B, Cin, H, W_sp), dtype=jnp.float32)
    w = jax.random.normal(k_w, (C_out, D), dtype=jnp.float32) / jnp.sqrt(jnp.float32(D))

    # Glue: the "model" output that JacobianReg differentiates through.
    x_flat = x.reshape(B, -1)
    y = x_flat @ w.T

    # --- random-projection mode (n = 1) ---
    reg = JacobianRegPallas(n=1)
    R = jax.block_until_ready(reg(x, y, w, k_v))

    # Reference: same semantics via jax.vjp (the analogue of torch.autograd.grad).
    def f(xx):
        return xx.reshape(xx.shape[0], -1) @ w.T

    V, num_proj = make_projection_vectors(k_v, 1, B, C_out)
    _, vjp_fn = jax.vjp(f, x)
    J2_ref = 0.0
    for ii in range(num_proj):
        (gx,) = vjp_fn(V[ii])
        J2_ref = J2_ref + C_out * jnp.sum(gx ** 2) / (num_proj * B)
    R_ref = jax.block_until_ready(0.5 * J2_ref)
    assert np.allclose(np.asarray(R), np.asarray(R_ref), rtol=1e-4, atol=1e-5), (
        float(R), float(R_ref))

    # --- exact mode (n = -1): R == 0.5 * ||W||_F^2 ---
    reg_exact = JacobianRegPallas(n=-1)
    R_exact = jax.block_until_ready(reg_exact(x, y, w, k_v))
    R_exact_ref = 0.5 * jnp.sum(w ** 2)
    assert np.allclose(np.asarray(R_exact), np.asarray(R_exact_ref),
                       rtol=1e-4, atol=1e-5), (float(R_exact), float(R_exact_ref))

    # --- native bf16 streaming of W (no wrapper-side f32 cast) ---
    G_bf = jax.block_until_ready(gram_ww_t(w.astype(jnp.bfloat16)))
    G_f32 = np.asarray(w, np.float32) @ np.asarray(w, np.float32).T
    assert np.allclose(np.asarray(G_bf), G_f32, rtol=3e-2, atol=3e-2)

    # --- multi-tile + ragged-last-tile path (forced tiny slab; no jnp.pad copy) ---
    D_odd = 1000  # not a multiple of the forced 128-column tile
    w_odd = jax.random.normal(k_odd, (C_out, D_odd), jnp.float32) / jnp.sqrt(
        jnp.float32(D_odd))
    G_odd = jax.block_until_ready(gram_ww_t(w_odd, max_slab_bytes=4096))
    G_odd_ref = np.asarray(w_odd) @ np.asarray(w_odd).T
    assert np.allclose(np.asarray(G_odd), G_odd_ref, rtol=1e-4, atol=1e-5)

    # --- big-D path (single large slab, no padding, lane-aligned D) ---
    D_big = 16640
    w_big = jax.random.normal(k_big, (C_out, D_big), jnp.float32) / jnp.sqrt(
        jnp.float32(D_big))
    G_big = jax.block_until_ready(gram_ww_t(w_big))
    tr_ref = jnp.sum(w_big ** 2)
    assert np.allclose(float(jnp.trace(G_big)), float(tr_ref), rtol=1e-3), (
        float(jnp.trace(G_big)), float(tr_ref))

    print("KERNEL_OK")
</pallas_src>

<mosaic_0001>
module attributes {stable_mosaic.version = 11 : i64} {
  func.func @_gram_kernel(%arg0: i32, %arg1: i32, %arg2: memref<8x1024xf32, #tpu.memory_space<vmem>>, %arg3: memref<1x8x8xf32, #tpu.memory_space<vmem>>) attributes {dimension_semantics = [#tpu.dimension_semantics<parallel>, #tpu.dimension_semantics<arbitrary>], iteration_bounds = array<i64: 1, 1>, scalar_prefetch = 0 : i64, scratch_operands = 0 : i64, tpu.core_type = #tpu.core_type<tc>, window_params = [{transform_indices = @transform_0, window_bounds = array<i64: 8, 1024>}, {transform_indices = @transform_1, window_bounds = array<i64: 1, 8, 8>}]} {
    %c0_i32 = arith.constant 0 : i32
    %0 = arith.cmpi eq, %arg1, %c0_i32 : i32
    %1 = arith.extui %0 : i1 to i32
    %c0_i32_0 = arith.constant 0 : i32
    %2 = arith.cmpi ne, %1, %c0_i32_0 : i32
    scf.if %2 {
      %cst_8 = arith.constant 0.000000e+00 : f32
      %11 = vector.broadcast %cst_8 : f32 to vector<8x8xf32>
      %c0_9 = arith.constant 0 : index
      %c0_10 = arith.constant 0 : index
      %c0_11 = arith.constant 0 : index
      %12 = vector.load %arg3[%c0_9, %c0_10, %c0_11] : memref<1x8x8xf32, #tpu.memory_space<vmem>>, vector<1x8x8xf32>
      %13 = vector.shape_cast %12 : vector<1x8x8xf32> to vector<8x8xf32>
      %14 = vector.shape_cast %11 : vector<8x8xf32> to vector<1x8x8xf32>
      tpu.vector_store %arg3[%c0_9, %c0_10, %c0_11], %14 {strides = array<i32>} : memref<1x8x8xf32, #tpu.memory_space<vmem>>, vector<1x8x8xf32>,
    } else {
    }
    %c0 = arith.constant 0 : index
    %c0_1 = arith.constant 0 : index
    %3 = vector.load %arg2[%c0, %c0_1] : memref<8x1024xf32, #tpu.memory_space<vmem>>, vector<8x1024xf32>
    %cst = arith.constant dense<0.000000e+00> : vector<8x8xf32>
    %4 = tpu.matmul %3, %3, %cst {dimension_numbers = #tpu.dot_dimension_numbers<[1], [1], [0], [0], [0, 0, 1, 0], [], []>} : vector<8x1024xf32>, vector<8x1024xf32>, vector<8x8xf32> -> vector<8x8xf32>
    %c0_2 = arith.constant 0 : index
    %c0_3 = arith.constant 0 : index
    %c0_4 = arith.constant 0 : index
    %5 = vector.load %arg3[%c0_2, %c0_3, %c0_4] : memref<1x8x8xf32, #tpu.memory_space<vmem>>, vector<1x8x8xf32>
    %6 = vector.shape_cast %5 : vector<1x8x8xf32> to vector<8x8xf32>
    %7 = arith.addf %6, %4 : vector<8x8xf32>
    %c0_5 = arith.constant 0 : index
    %c0_6 = arith.constant 0 : index
    %c0_7 = arith.constant 0 : index
    %8 = vector.load %arg3[%c0_5, %c0_6, %c0_7] : memref<1x8x8xf32, #tpu.memory_space<vmem>>, vector<1x8x8xf32>
    %9 = vector.shape_cast %8 : vector<1x8x8xf32> to vector<8x8xf32>
    %10 = vector.shape_cast %7 : vector<8x8xf32> to vector<1x8x8xf32>
    tpu.vector_store %arg3[%c0_5, %c0_6, %c0_7], %10 {strides = array<i32>} : memref<1x8x8xf32, #tpu.memory_space<vmem>>, vector<1x8x8xf32>,
    return
  }
  func.func @transform_0(%arg0: i32, %arg1: i32) -> (i32, i32) {
    %c1_i32 = arith.constant 1 : i32
    %0 = arith.muli %arg0, %c1_i32 : i32
    %1 = arith.addi %0, %arg1 : i32
    %c0_i32 = arith.constant 0 : i32
    %c0_i32_0 = arith.constant 0 : i32
    return %c0_i32, %1 : i32, i32
  }
  func.func @transform_1(%arg0: i32, %arg1: i32) -> (i32, i32, i32) {
    %c0_i32 = arith.constant 0 : i32
    %c0_i32_0 = arith.constant 0 : i32
    %c0_i32_1 = arith.constant 0 : i32
    return %arg0, %c0_i32, %c0_i32_0 : i32, i32, i32
  }
}

</mosaic_0001>

<bundles_post_ra>
// kernel: tpu_custom_call.1
= control target key start
LH: loop header
LB: loop body
LE: loop exit
PB: predicated region body
PF: predicated region fallthrough
CT: control target
= control target key end

     0   :  { %6 = vsyncpa [#allocation3], 0  ;;  %s408_s0 = inlined_call_operand.hbm [shape: f32[8,1024], index: 0, kind: input, shape index: {}]   ;;  %s409_s1 = inlined_call_operand.hbm [shape: f32[1,8,8], index: 1, kind: output, shape index: {}]  }
   0x1   :  { %7 = vsyncpa [#allocation4], 0  ;;  %s387_s6 = smov [#allocation2]  }
   0x2   :  { %s18_s7 = sshll.u32 %s387_s6, 4  ;;  %s19_s7 = int_to_ptr.vmem [resolvable:$true] %s18_s7 }
   0x3   :  { %s351_s8 = scalar_lea.vmem %s19_s7, 1024  ;;  %p356_p1 = scmp.lt.s32.totalorder %s19_s7, %s19_s7 }
   0x4   :  { %p352_p0 = scmp.ne.s32.totalorder %s19_s7, %s351_s8  ;;  %p357_p2 = scmp.lt.s32.totalorder %s351_s8, %s351_s8 }
   0x6   :  { %p358_p3 = por %p357_p2, %p356_p1 }
   0x8   :  { %p359_p4 = pnand %p358_p3, %p352_p0 }
   0xa   :  { %362 = shalt.err (!%p359_p4)
}
   0xb   :  { %21 = dma.hbm_to_vmem [thread:$0]  %s408_s0, 1024, %s19_s7, [#allocation3]  }
   0xc   :  { %383 = dma.done.wait [#allocation3], 1024  }
   0xd   :  { %384 = vsyncadd [#allocation3], 4294966272  ;;  %v34_v0 = vld [vmem:[#allocation2 + $0x8] sm:$0xff]  ;;  %v33_v1 = vld [vmem:[#allocation2] sm:$0xff]  ;;  %vm31_vm0 = vcmask 64512   ;;  %v388_v8 = vmov 0.0  }
   0xe   :  { %v36_v2 = vld [vmem:[#allocation2 + $0x18] sm:$0xff]  ;;  %71 = vmatprep.subr.mxu0 %v34_v0  ;;  %v35_v3 = vld [vmem:[#allocation2 + $0x10] sm:$0xff]  ;;  %v38_v4 = vld [vmem:[#allocation2 + $0x28] sm:$0xff]  ;;  %105 = vmatprep.mubr.f32.mxu0 %v34_v0  ;;  %32 = vst.msk [vmem:[#allocation5] sm:$0xff] %vm31_vm0, %v388_v8  ;;  %s389_s0 = smov [#allocation5]  }
   0xf   :  { %141 = vmatprep.subr.mxu1 %v36_v2  ;;  %72 = vmatpush1.xpose.msra.mxu0 %v33_v1  ;;  %v40_v5 = vld [vmem:[#allocation2 + $0x38] sm:$0xff]  ;;  %v37_v6 = vld [vmem:[#allocation2 + $0x20] sm:$0xff]  ;;  %v39_v7 = vld [vmem:[#allocation2 + $0x30] sm:$0xff]  ;;  %s331_s11 = sshll.u32 %s389_s0, 4  ;;  %s332_s11 = int_to_ptr.vmem [resolvable:$true] %s331_s11 }
  0x10   :  { %142 = vmatpush1.xpose.msra.mxu1 %v35_v3  ;;  %175 = vmatprep.mubr.f32.mxu1 %v36_v2  ;;  %s363_s12 = scalar_lea.vmem %s332_s11, 128  ;;  %p368_p6 = scmp.lt.s32.totalorder %s332_s11, %s332_s11 }
  0x11   :  { %211 = vmatprep.subr.mxu0 %v38_v4  ;;  %281 = vmatprep.subr.mxu1 %v40_v5  ;;  %p364_p5 = scmp.ne.s32.totalorder %s332_s11, %s363_s12  ;;  %p369_p7 = scmp.lt.s32.totalorder %s363_s12, %s363_s12 }
  0x12   :  { %106 = vmatmul.mubr.f32.vlgmr.msra.gmra.mxu0 %v33_v1 }
  0x13   :  { %176 = vmatmul.mubr.f32.vlgmr.msra.gmra.mxu1 %v35_v3  ;;  %212 = vmatpush1.xpose.msra.mxu0 %v37_v6  ;;  %p370_p8 = por %p369_p7, %p368_p6 }
  0x14   :  { %282 = vmatpush1.xpose.msra.mxu1 %v39_v7  ;;  %245 = vmatprep.mubr.f32.mxu0 %v38_v4 }
  0x15   :  { %315 = vmatprep.mubr.f32.mxu1 %v40_v5  ;;  %v321_v17 = vld [vmem:[#allocation5] sm:$0xff]  ;;  %p371_p9 = pnand %p370_p8, %p364_p5 }
  0x16   :  { %246 = vmatmul.mubr.f32.vlgmr.msra.gmra.mxu0 %v37_v6 }
  0x17   :  { %316 = vmatmul.mubr.f32.vlgmr.msra.gmra.mxu1 %v39_v7 }
  0xd2   :  { %v107_v9 = vpop.f32.mrf.mxu0 }
  0xd3   :  { %v177_v10 = vpop.f32.mrf.mxu1 }
  0xd4   :  { %v109_v11 = vpop.f32.mrf.mxu0  ;;  %v178_v13 = vadd.f32 %v177_v10, %v107_v9 }
  0xd5   :  { %v179_v12 = vpop.f32.mrf.mxu1 }
  0xd6   :  { %v247_v14 = vpop.f32.mrf.mxu0 }
  0xd7   :  { %v317_v15 = vpop.f32.mrf.mxu1  ;;  %v248_v16 = vadd.f32 %v247_v14, %v178_v13 }
  0xd8   :  { %v249_v18 = vpop.f32.mrf.mxu0 }
  0xd9   :  { %v319_v19 = vpop.f32.mrf.mxu1  ;;  %v318_v20 = vadd.f32 %v317_v15, %v248_v16 }
  0xdb   :  { %v322_v21 = vadd.f32 %v321_v17, %v318_v20 }
  0xdd   :  { %324 = vst.msk [vmem:[#allocation5] sm:$0xff] %vm31_vm0, %v322_v21 }
  0xde   :  { %374 = shalt.err (!%p371_p9)
}
  0xdf   :  { %334 = dma.vmem_to_hbm [thread:$0]  %s332_s11, 128, %s409_s1, [#allocation4]  }
  0xe0   :  { %385 = dma.done.wait [#allocation4], 128  }
  0xe1   :  { %386 = vsyncadd [#allocation4], 4294967168 }
  0xe2   :  { %338 = vsyncpa [#allocation3], 1 }
  0xe3   :  { %339 = vsyncpa [#allocation4], 1 }

</bundles_post_ra>
